<compile_context>
chip_gen: v7x
topology: tpu7x:2x2x1
jax: 0.10.0
libtpu: 0.0.40
codegen_flags: <defaults>
</compile_context>

<pallas_src>
import jax
import jax.numpy as jnp
from jax.experimental import pallas as pl
from jax.experimental.pallas import tpu as pltpu


def mlp_kernel(x_ref, w1_ref, b1_ref, w2_ref, b2_ref, w3_ref, b3_ref, o_ref):
    """Forward pass for one batch tile: (TILE_B, n_features) -> (TILE_B, 1)."""
    x = x_ref[...]

    # fc1 + ReLU (MXU matmul in x.dtype, f32 accumulation; ReLU stays f32).
    h1 = jnp.dot(x, w1_ref[...], preferred_element_type=jnp.float32) + b1_ref[...]
    h1 = jnp.maximum(h1, 0.0)

    # fc2 + ReLU (f32 weights, f32 throughout).
    h2 = jnp.dot(h1, w2_ref[...], preferred_element_type=jnp.float32) + b2_ref[...]
    h2 = jnp.maximum(h2, 0.0)

    # fc3 + Sigmoid (sigmoid's exp runs on the EUP, off the VALU critical path).
    z = jnp.dot(h2, w3_ref[...], preferred_element_type=jnp.float32) + b3_ref[...]
    o_ref[...] = jax.nn.sigmoid(z).astype(o_ref.dtype)


def _round_up(n: int, m: int) -> int:
    return ((n + m - 1) // m) * m


def _padded_2d_bytes(shape, itemsize: int) -> int:
    """(8,128)-tile-padded VMEM footprint of a 2-D buffer."""
    r, c = shape
    return _round_up(max(int(r), 1), 8) * _round_up(max(int(c), 1), 128) * itemsize


def _vmem_capacity_bytes() -> int:
    """Per-core VMEM capacity; conservative fallback if the query is unavailable."""
    try:
        info = pltpu.get_tpu_info()
        cap = getattr(info, "vmem_capacity_bytes", None)
        if cap:
            return int(cap)
    except Exception:
        pass
    return 64 * 1024 * 1024  # v7x per-TC physical VMEM (the smallest current gen)


def net_forward(x, params, *, tile_b=None, vmem_budget_bytes=None):
    """Batch-tiled Pallas forward pass of the 3-layer MLP.

    x: (batch, n_features). Pass bf16 x for ~2x less HBM read traffic on fc1
    (accumulation stays f32). Returns (batch, 1) in x.dtype.
    """
    w1, b1, w2, b2, w3, b3 = params
    batch, n_features = x.shape
    itemsize = jnp.dtype(x.dtype).itemsize
    out_dtype = x.dtype
    out_itemsize = jnp.dtype(out_dtype).itemsize

    # fc1 weights follow x's dtype (bf16 MXU path when x is bf16); everything
    # downstream of the first accumulator stays f32.
    w1 = w1.astype(x.dtype)
    w2, w3 = (w.astype(jnp.float32) for w in (w2, w3))
    b1, b2, b3 = (b.astype(jnp.float32) for b in (b1, b2, b3))

    # ---- VMEM accounting with real (8,128)-padded footprints -----------------
    capacity = _vmem_capacity_bytes()
    if vmem_budget_bytes is None:
        # Safe per-TC working-set budget on every generation (v7x: 64 MiB phys,
        # both TCs active under the "parallel" split -> stay well under 32 MiB).
        vmem_budget_bytes = min(capacity // 2, 32 * 1024 * 1024)

    lanes = 128
    # Per-row cost of the streamed, double-buffered tiles + in-kernel f32
    # intermediates (h1, h2, z each occupy a full lane-padded 128-wide column).
    in_bytes_per_row = 2 * _round_up(n_features, lanes) * itemsize      # x tile (x2 dbl buf)
    out_bytes_per_row = 2 * lanes * out_itemsize                        # (TILE_B,1) -> 128 lanes
    mid_bytes_per_row = 3 * lanes * 4                                   # h1, h2, z (f32)
    bytes_per_row = in_bytes_per_row + out_bytes_per_row + mid_bytes_per_row

    # Resident weights/biases (constant index_map -> DMA'd once); count x2 to be
    # conservative about double-buffer allocation. They are tiny (~tens of KiB).
    weights_bytes = 2 * sum(
        _padded_2d_bytes(a.shape, jnp.dtype(a.dtype).itemsize)
        for a in (w1, b1, w2, b2, w3, b3)
    )

    tile_cap = max(8, (vmem_budget_bytes - weights_bytes) // bytes_per_row)

    if tile_b is None:
        tile_b = 16384  # aim for a multi-MiB x tile; clamped by tile_cap below
    tile_b = int(min(tile_b, tile_cap, _round_up(batch, 8)))
    tile_b = max(8, (tile_b // 8) * 8)  # sublane multiple

    # Derive the scoped-VMEM limit from the actual working set + ~25% headroom.
    working_set = weights_bytes + tile_b * bytes_per_row
    vmem_limit = int(min(capacity, max(working_set * 5 // 4, 16 * 1024 * 1024)))

    # ---- Grid / specs: no batch padding; ragged tail block handled by Pallas --
    grid = (pl.cdiv(batch, tile_b),)

    x_spec = pl.BlockSpec((tile_b, n_features), lambda i: (i, 0))
    out_spec = pl.BlockSpec((tile_b, 1), lambda i: (i, 0))

    def resident(arr):
        # Constant block index -> fetched once, stays VMEM-resident across steps.
        return pl.BlockSpec(arr.shape, lambda i: (0, 0))

    # Advisory cost: the kernel is HBM-bandwidth bound on reading x.
    flops = 2 * batch * (n_features * 5 + 5 * 3 + 3 * 1)
    bytes_accessed = (
        batch * n_features * itemsize
        + batch * 1 * out_itemsize
        + sum(int(a.size) * jnp.dtype(a.dtype).itemsize for a in (w1, b1, w2, b2, w3, b3))
    )
    cost = pl.CostEstimate(
        flops=int(flops), transcendentals=int(batch), bytes_accessed=int(bytes_accessed)
    )

    out = pl.pallas_call(
        mlp_kernel,
        out_shape=jax.ShapeDtypeStruct((batch, 1), out_dtype),
        grid=grid,
        in_specs=[
            x_spec,
            resident(w1), resident(b1),
            resident(w2), resident(b2),
            resident(w3), resident(b3),
        ],
        out_specs=out_spec,
        compiler_params=pltpu.CompilerParams(
            dimension_semantics=("parallel",),   # megacore split on v7x
            vmem_limit_bytes=vmem_limit,
        ),
        cost_estimate=cost,
    )(x, w1, b1, w2, b2, w3, b3)

    return out


def init_params(key, n_features):
    """Deterministic init mimicking nn.Linear's uniform(-1/sqrt(fan_in), ...)."""
    def linear(key, fan_in, fan_out):
        kw, kb = jax.random.split(key)
        bound = 1.0 / jnp.sqrt(float(fan_in))
        # Stored as (in, out) so the kernel can do x @ W directly.
        w = jax.random.uniform(kw, (fan_in, fan_out), jnp.float32, -bound, bound)
        b = jax.random.uniform(kb, (1, fan_out), jnp.float32, -bound, bound)
        return w, b

    k1, k2, k3 = jax.random.split(key, 3)
    w1, b1 = linear(k1, n_features, 5)
    w2, b2 = linear(k2, 5, 3)
    w3, b3 = linear(k3, 3, 1)
    return (w1, b1, w2, b2, w3, b3)


if __name__ == "__main__":
    key = jax.random.PRNGKey(0)
    k_params, k_x = jax.random.split(key)

    # Small demo: batch=300 is deliberately NOT a multiple of tile_b (or of 8)
    # to exercise the un-padded ragged-tail path; tile_b is forced small (128)
    # so the demo runs a 3-step batch grid through the pipeline.  Production
    # callers should leave tile_b=None and let the VMEM-budgeted sizing pick a
    # multi-MiB tile.
    batch, n_features = 300, 32
    params = init_params(k_params, n_features)
    x = jax.random.normal(k_x, (batch, n_features), jnp.float32)

    fwd = jax.jit(lambda xx: net_forward(xx, params, tile_b=128))
    out = fwd(x)
    jax.block_until_ready(out)

    # Pure-JAX reference check (same math, outside Pallas).
    w1, b1, w2, b2, w3, b3 = params
    ref = jax.nn.sigmoid(
        jnp.maximum(jnp.maximum(x @ w1 + b1, 0.0) @ w2 + b2, 0.0) @ w3 + b3
    )
    assert out.shape == (batch, 1)
    assert jnp.allclose(out, ref, atol=1e-5), "mismatch vs reference"

    print("KERNEL_OK")
</pallas_src>

<mosaic_0001>
module attributes {stable_mosaic.version = 11 : i64} {
  func.func @mlp_kernel(%arg0: i32, %arg1: memref<128x32xf32, #tpu.memory_space<vmem>>, %arg2: memref<32x5xf32, #tpu.memory_space<vmem>>, %arg3: memref<1x5xf32, #tpu.memory_space<vmem>>, %arg4: memref<5x3xf32, #tpu.memory_space<vmem>>, %arg5: memref<1x3xf32, #tpu.memory_space<vmem>>, %arg6: memref<3x1xf32, #tpu.memory_space<vmem>>, %arg7: memref<1x1xf32, #tpu.memory_space<vmem>>, %arg8: memref<128x1xf32, #tpu.memory_space<vmem>>) attributes {dimension_semantics = [#tpu.dimension_semantics<parallel>], iteration_bounds = array<i64: 3>, scalar_prefetch = 0 : i64, scratch_operands = 0 : i64, tpu.core_type = #tpu.core_type<tc>, window_params = [{transform_indices = @transform_0, window_bounds = array<i64: 128, 32>}, {pipeline_mode = #tpu.pipeline_mode<synchronous>, transform_indices = @transform_1, window_bounds = array<i64: 32, 5>}, {pipeline_mode = #tpu.pipeline_mode<synchronous>, transform_indices = @transform_2, window_bounds = array<i64: 1, 5>}, {pipeline_mode = #tpu.pipeline_mode<synchronous>, transform_indices = @transform_3, window_bounds = array<i64: 5, 3>}, {pipeline_mode = #tpu.pipeline_mode<synchronous>, transform_indices = @transform_4, window_bounds = array<i64: 1, 3>}, {pipeline_mode = #tpu.pipeline_mode<synchronous>, transform_indices = @transform_5, window_bounds = array<i64: 3, 1>}, {pipeline_mode = #tpu.pipeline_mode<synchronous>, transform_indices = @transform_6, window_bounds = array<i64: 1, 1>}, {transform_indices = @transform_7, window_bounds = array<i64: 128, 1>}]} {
    %c0 = arith.constant 0 : index
    %c0_0 = arith.constant 0 : index
    %0 = vector.load %arg1[%c0, %c0_0] : memref<128x32xf32, #tpu.memory_space<vmem>>, vector<128x32xf32>
    %c0_1 = arith.constant 0 : index
    %c0_2 = arith.constant 0 : index
    %1 = vector.load %arg2[%c0_1, %c0_2] : memref<32x5xf32, #tpu.memory_space<vmem>>, vector<32x5xf32>
    %cst = arith.constant dense<0.000000e+00> : vector<128x5xf32>
    %2 = tpu.matmul %0, %1, %cst {dimension_numbers = #tpu.dot_dimension_numbers<[1], [0], [0], [1], [0, 0, 1, 1], [], []>} : vector<128x32xf32>, vector<32x5xf32>, vector<128x5xf32> -> vector<128x5xf32>
    %c0_3 = arith.constant 0 : index
    %c0_4 = arith.constant 0 : index
    %3 = vector.load %arg3[%c0_3, %c0_4] : memref<1x5xf32, #tpu.memory_space<vmem>>, vector<1x5xf32>
    %4 = vector.broadcast %3 : vector<1x5xf32> to vector<128x5xf32>
    %5 = arith.addf %2, %4 : vector<128x5xf32>
    %cst_5 = arith.constant 0.000000e+00 : f32
    %6 = vector.broadcast %cst_5 : f32 to vector<128x5xf32>
    %7 = arith.maximumf %5, %6 : vector<128x5xf32>
    %c0_6 = arith.constant 0 : index
    %c0_7 = arith.constant 0 : index
    %8 = vector.load %arg4[%c0_6, %c0_7] : memref<5x3xf32, #tpu.memory_space<vmem>>, vector<5x3xf32>
    %cst_8 = arith.constant dense<0.000000e+00> : vector<128x3xf32>
    %9 = tpu.matmul %7, %8, %cst_8 {dimension_numbers = #tpu.dot_dimension_numbers<[1], [0], [0], [1], [0, 0, 1, 1], [], []>} : vector<128x5xf32>, vector<5x3xf32>, vector<128x3xf32> -> vector<128x3xf32>
    %c0_9 = arith.constant 0 : index
    %c0_10 = arith.constant 0 : index
    %10 = vector.load %arg5[%c0_9, %c0_10] : memref<1x3xf32, #tpu.memory_space<vmem>>, vector<1x3xf32>
    %11 = vector.broadcast %10 : vector<1x3xf32> to vector<128x3xf32>
    %12 = arith.addf %9, %11 : vector<128x3xf32>
    %cst_11 = arith.constant 0.000000e+00 : f32
    %13 = vector.broadcast %cst_11 : f32 to vector<128x3xf32>
    %14 = arith.maximumf %12, %13 : vector<128x3xf32>
    %c0_12 = arith.constant 0 : index
    %c0_13 = arith.constant 0 : index
    %15 = vector.load %arg6[%c0_12, %c0_13] : memref<3x1xf32, #tpu.memory_space<vmem>>, vector<3x1xf32>
    %cst_14 = arith.constant dense<0.000000e+00> : vector<128x1xf32>
    %16 = tpu.matmul %14, %15, %cst_14 {dimension_numbers = #tpu.dot_dimension_numbers<[1], [0], [0], [1], [0, 0, 1, 1], [], []>} : vector<128x3xf32>, vector<3x1xf32>, vector<128x1xf32> -> vector<128x1xf32>
    %c0_15 = arith.constant 0 : index
    %c0_16 = arith.constant 0 : index
    %17 = vector.load %arg7[%c0_15, %c0_16] : memref<1x1xf32, #tpu.memory_space<vmem>>, vector<1x1xf32>
    %18 = vector.broadcast %17 : vector<1x1xf32> to vector<128x1xf32>
    %19 = arith.addf %16, %18 : vector<128x1xf32>
    %20 = arith.negf %19 : vector<128x1xf32>
    %21 = math.exp %20 : vector<128x1xf32>
    %cst_17 = arith.constant 1.000000e+00 : f32
    %22 = vector.broadcast %cst_17 : f32 to vector<128x1xf32>
    %23 = arith.addf %22, %21 : vector<128x1xf32>
    %24 = arith.divf %22, %23 : vector<128x1xf32>
    %c0_18 = arith.constant 0 : index
    %c0_19 = arith.constant 0 : index
    %25 = vector.load %arg8[%c0_18, %c0_19] : memref<128x1xf32, #tpu.memory_space<vmem>>, vector<128x1xf32>
    tpu.vector_store %arg8[%c0_18, %c0_19], %24 {strides = array<i32>} : memref<128x1xf32, #tpu.memory_space<vmem>>, vector<128x1xf32>,
    return
  }
  func.func @transform_0(%arg0: i32) -> (i32, i32) {
    %c0_i32 = arith.constant 0 : i32
    %c0_i32_0 = arith.constant 0 : i32
    return %arg0, %c0_i32 : i32, i32
  }
  func.func @transform_1(%arg0: i32) -> (i32, i32) {
    %c0_i32 = arith.constant 0 : i32
    %c0_i32_0 = arith.constant 0 : i32
    %c0_i32_1 = arith.constant 0 : i32
    return %c0_i32, %c0_i32_0 : i32, i32
  }
  func.func @transform_2(%arg0: i32) -> (i32, i32) {
    %c0_i32 = arith.constant 0 : i32
    %c0_i32_0 = arith.constant 0 : i32
    %c0_i32_1 = arith.constant 0 : i32
    return %c0_i32, %c0_i32_0 : i32, i32
  }
  func.func @transform_3(%arg0: i32) -> (i32, i32) {
    %c0_i32 = arith.constant 0 : i32
    %c0_i32_0 = arith.constant 0 : i32
    %c0_i32_1 = arith.constant 0 : i32
    return %c0_i32, %c0_i32_0 : i32, i32
  }
  func.func @transform_4(%arg0: i32) -> (i32, i32) {
    %c0_i32 = arith.constant 0 : i32
    %c0_i32_0 = arith.constant 0 : i32
    %c0_i32_1 = arith.constant 0 : i32
    return %c0_i32, %c0_i32_0 : i32, i32
  }
  func.func @transform_5(%arg0: i32) -> (i32, i32) {
    %c0_i32 = arith.constant 0 : i32
    %c0_i32_0 = arith.constant 0 : i32
    %c0_i32_1 = arith.constant 0 : i32
    return %c0_i32, %c0_i32_0 : i32, i32
  }
  func.func @transform_6(%arg0: i32) -> (i32, i32) {
    %c0_i32 = arith.constant 0 : i32
    %c0_i32_0 = arith.constant 0 : i32
    %c0_i32_1 = arith.constant 0 : i32
    return %c0_i32, %c0_i32_0 : i32, i32
  }
  func.func @transform_7(%arg0: i32) -> (i32, i32) {
    %c0_i32 = arith.constant 0 : i32
    %c0_i32_0 = arith.constant 0 : i32
    return %arg0, %c0_i32 : i32, i32
  }
}

</mosaic_0001>

<bundles_post_ra>
// kernel: _lambda_.1
= control target key start
LH: loop header
LB: loop body
LE: loop exit
PB: predicated region body
PF: predicated region fallthrough
CT: control target
= control target key end

     0   :  { %s2168_s0 = inlined_call_operand.vmem [shape: f32[300,32], index: 0, kind: input, shape index: {}]   ;;  %s2169_s1 = inlined_call_operand.vmem [shape: f32[32,5], index: 1, kind: input, shape index: {}]   ;;  %s2170_s2 = inlined_call_operand.vmem [shape: f32[1,5], index: 2, kind: input, shape index: {}]   ;;  %s2171_s3 = inlined_call_operand.vmem [shape: f32[5,3], index: 3, kind: input, shape index: {}]   ;;  %s2172_s4 = inlined_call_operand.vmem [shape: f32[1,3], index: 4, kind: input, shape index: {}]   ;;  %s2173_s5 = inlined_call_operand.vmem [shape: f32[3,1], index: 5, kind: input, shape index: {}]   ;;  %s2174_s6 = inlined_call_operand.<no memory space> [shape: f32[1,1], index: 6, kind: input, shape index: {}]   ;;  %s2175_s7 = inlined_call_operand.vmem [shape: f32[300,1], index: 7, kind: output, shape index: {}]  }
   0x1   :  { %v12_v0 = vstv %s2174_s6 }
   0x2   :  { %13 = vst [vmem:[#allocation2] sm:$0x1] %v12_v0 }
   0x3   :  { %s1882_s26 = smov 0   ;;  %s1884_s27 = smov 0  }
   0x4   :  { %s1886_s28 = smov 0  }
   0x5 LB: > { %s1895_s6 = sadd.s32 4294967295, %s1805_s28   ;;  %s1897_s29 = sadd.s32 1, %s1805_s28   ;;  %s1805_s28 = sphi %s1886_s28, %s2182_s28   ;;  %s1801_s27 = sphi %s1884_s27, %s2181_s27   ;;  %s1797_s26 = sphi %s1882_s26, %s2180_s26  }
   0x6   : > { %s175_s30 = ssub.s32 %s1805_s28, %s1897_s29  ;;  %s178_s8 = sadd.s32 1, %s1801_s27 }
   0x7   : > { %p176_p0 = scmp.eq.s32.totalorder %s175_s30, 0  ;;  %p188_p1 = scmp.ne.s32.totalorder %s1801_s27, %s1797_s26 }
   0x8   : > { %p189_p2 = scmp.eq.s32.totalorder %s1895_s6, 2  ;;  %p1358_p3 = scmp.ge.s32.totalorder %s1805_s28, 1 }
   0x9   : > { %s1905_s9 = scalar_select %p176_p0, %s1801_s27, %s178_s8  }
   0xa   : > { %p1907_p4 = por %p189_p2, %p188_p1  ;;  %p248_p5 = scmp.lt.s32.totalorder %s1805_s28, 4 }
   0xc   : > { %p249_p6 = pnand %p1358_p3, %p248_p5 }
   0xd   : > { %v318_v1 = vld [vmem:[%s2169_s1] sm:$0xff] (!%p249_p6)  ;;  %v319_v2 = vld [vmem:[%s2169_s1 + $0x8] sm:$0xff] (!%p249_p6)  ;;  %v320_v3 = vld [vmem:[%s2169_s1 + $0x10] sm:$0xff] (!%p249_p6)  ;;  %s1921_s17 = sshll.u32 (!%p249_p6), %s1895_s6, 4  ;;  %vm596_vm0 = vcmask (!%p249_p6), 1044480   ;;  %vm329_vm1 = vcmask (!%p249_p6), 261120  }
   0xe   : > { %252 = sbr.rel (%p249_p6) target bundleno = 784 (0x310), region = 48  ;;  %v1589_v4 = vpack.c.bf16 (!%p249_p6), %v319_v2, %v318_v1  ;;  %v321_v5 = vld [vmem:[%s2169_s1 + $0x18] sm:$0xff] (!%p249_p6)  ;;  %p288_p7 = scmp.lt.s32.totalorder (!%p249_p6), %s1921_s17, 37  ;;  %v539_v6 = vld [vmem:[%s2171_s3] sm:$0x1f] (!%p249_p6)  ;;  %vm818_vm2 = vcmask (!%p249_p6), 1042432  }
   0xf   : > { %v1593_v7 = vpack.c.bf16 (!%p249_p6), %v321_v5, %v320_v3  ;;  %1597 = vmatprep.subr.msk.mxu1 (!%p249_p6), %vm596_vm0, %v539_v6  ;;  %v761_v24 = vld [vmem:[%s2173_s5] sm:$0x7] (!%p249_p6)  ;;  %vm547_vm3 = vcmask (!%p249_p6), 39936   ;;  %vm769_vm4 = vcmask (!%p249_p6), 23552   ;;  %s280_s15 = sand.u32 (!%p249_p6), 1, %s1797_s26   ;;  %vm1063_vm5 = vcmask (!%p249_p6), 7168  }
  0x10   : > { %1590 = vmatprep.subr.bf16.mxu0 (!%p249_p6), %v1589_v4  ;;  %1598 = vmatpush3.msk.msra.mxu1 (!%p249_p6), %vm596_vm0, %v539_v6  ;;  %v1362_v25 = vld [vmem:[%s2170_s2] ss:$0 sm:$0xff] (!%p249_p6)  ;;  %s1359_s16 = sshll.u32 (!%p249_p6), %s280_s15, 7 }
  0x11   : > { %1592 = vmatpush3.bf16.msra.mxu0 (!%p249_p6), %v1589_v4  ;;  %1563 = vmatprep.subr.msk.mxu1 (!%p249_p6), %vm818_vm2, %v761_v24  ;;  %s2032_s26 = scalar_lea.vmem (!%p249_p6), [#allocation3], %s1359_s16  }
  0x12   : > { %1594 = vmatprep.subr.bf16.mxu0 (!%p249_p6), %v1593_v7 }
  0x15   : > { %s289_s22 = scalar_select %p288_p7, %s1921_s17, 37  ;;  %1596 = vmatpush3.bf16.msra.mxu0 %v1593_v7 }
  0x16   : > { %1537 = vmatprep.subr.msk.mxu0 %vm596_vm0, %v539_v6  ;;  %s1088_s18 = ssub.s32 (%p1907_p4), 38, %s1921_s17  ;;  %s1448_s19 = sshll.u32 (%p1907_p4), %s1895_s6, 7 }
  0x17   : > { %s1361_s23 = sshll.u32 %s289_s22, 3  ;;  %p1089_p8 = scmp.lt.s32.totalorder (%p1907_p4), %s1088_s18, 16 }
  0x18   : > { %s1936_s28 = scalar_lea.vmem %s2168_s0, %s1361_s23  ;;  %s2075_s22 = scalar_lea.vmem (%p1907_p4), %s2175_s7, %s1448_s19  }
  0x19   : > { %v302_v8 = vld [vmem:[%s1936_s28] sm:$0xff]  ;;  %v303_v9 = vld [vmem:[%s1936_s28 + $0x8] sm:$0xff]  ;;  %v304_v10 = vld [vmem:[%s1936_s28 + $0x10] sm:$0xff] }
  0x1a   : > { %1513 = vmatprep.mubr.msk.f32.mxu0 %vm329_vm1, %v302_v8  ;;  %v305_v11 = vld [vmem:[%s1936_s28 + $0x18] sm:$0xff]  ;;  %v306_v12 = vld [vmem:[%s1936_s28 + $0x20] sm:$0xff]  ;;  %v307_v13 = vld [vmem:[%s1936_s28 + $0x28] sm:$0xff] }
  0x1b   : > { %1514 = vmatmul.mubr.msk.f32.vlgmr.msra.gmra.mrb[0].mxu0 %vm329_vm1, %v303_v9  ;;  %v308_v14 = vld [vmem:[%s1936_s28 + $0x30] sm:$0xff]  ;;  %v309_v15 = vld [vmem:[%s1936_s28 + $0x38] sm:$0xff]  ;;  %v310_v16 = vld [vmem:[%s1936_s28 + $0x40] sm:$0xff] }
  0x1c   : > { %1516 = vmatprep.mubr.msk.f32.mxu0 %vm329_vm1, %v304_v10  ;;  %1538 = vmatpush3.msk.msra.mxu0 %vm596_vm0, %v539_v6  ;;  %v311_v17 = vld [vmem:[%s1936_s28 + $0x48] sm:$0xff]  ;;  %v312_v18 = vld [vmem:[%s1936_s28 + $0x50] sm:$0xff]  ;;  %v313_v19 = vld [vmem:[%s1936_s28 + $0x58] sm:$0xff] }
  0x1d   : > { %v314_v20 = vld [vmem:[%s1936_s28 + $0x60] sm:$0xff]  ;;  %v315_v21 = vld [vmem:[%s1936_s28 + $0x68] sm:$0xff]  ;;  %v316_v22 = vld [vmem:[%s1936_s28 + $0x70] sm:$0xff] }
  0x1e   : > { %v317_v23 = vld [vmem:[%s1936_s28 + $0x78] sm:$0xff]  ;;  %v1379_v10 = vld [vmem:[%s2172_s4] ss:$0 sm:$0xff] }
  0x1f   : > { %1517 = vmatmul.mubr.msk.f32.gmra.mrb[2].mxu0 %vm329_vm1, %v305_v11 }
  0x20   : > { %1519 = vmatprep.mubr.msk.f32.mxu0 %vm329_vm1, %v306_v12 }
  0x23   : > { %1520 = vmatmul.mubr.msk.f32.gmra.mrb[4].mxu0 %vm329_vm1, %v307_v13 }
  0x24   : > { %1522 = vmatprep.mubr.msk.f32.mxu0 %vm329_vm1, %v308_v14 }
  0x27   : > { %1523 = vmatmul.mubr.msk.f32.gmra.mrb[6].mxu0 %vm329_vm1, %v309_v15 }
  0x28   : > { %1525 = vmatprep.mubr.msk.f32.mxu0 %vm329_vm1, %v310_v16 }
  0x2b   : > { %1526 = vmatmul.mubr.msk.f32.gmra.mrb[8].mxu0 %vm329_vm1, %v311_v17 }
  0x2c   : > { %1528 = vmatprep.mubr.msk.f32.mxu0 %vm329_vm1, %v312_v18 }
  0x2f   : > { %1529 = vmatmul.mubr.msk.f32.gmra.mrb[10].mxu0 %vm329_vm1, %v313_v19 }
  0x30   : > { %1531 = vmatprep.mubr.msk.f32.mxu0 %vm329_vm1, %v314_v20 }
  0x33   : > { %1532 = vmatmul.mubr.msk.f32.gmra.mrb[12].mxu0 %vm329_vm1, %v315_v21 }
  0x34   : > { %1534 = vmatprep.mubr.msk.f32.mxu0 %vm329_vm1, %v316_v22 }
  0x37   : > { %1535 = vmatmul.mubr.msk.f32.gmra.mrb[14].mxu0 %vm329_vm1, %v317_v23 }
  0xee   : > { %v1515_v26 = vpop.f32.mrb[0].mxu0 }
  0xef   : > { %v450_v27 = vadd.f32 %v1515_v26, %v1362_v25  ;;  %v444_v28 = vpop.f32.mrb[1].mxu0 }
  0xf0   : > { %v445_v29 = vadd.f32 %v1362_v25, %v444_v28 }
  0xf1   : > { %v524_v32 = vmax.f32 %v450_v27, 0.0 }
  0xf2   : > { %v523_v30 = vmax.f32 %v445_v29, 0.0  ;;  %v1518_v31 = vpop.f32.mrb[2].mxu0 }
  0xf3   : > { %v460_v33 = vadd.f32 %v1518_v31, %v1362_v25  ;;  %v454_v34 = vpop.f32.mrb[3].mxu0 }
  0xf4   : > { %v455_v35 = vadd.f32 %v1362_v25, %v454_v34  ;;  %1539 = vmatprep.mubr.msk.f32.mxu0 %vm547_vm3, %v523_v30 }
  0xf5   : > { %1540 = vmatmul.mubr.msk.f32.vlgmr.msra.gmra.mrb[16].mxu0 %vm547_vm3, %v524_v32  ;;  %v526_v38 = vmax.f32 %v460_v33, 0.0 }
  0xf6   : > { %v525_v36 = vmax.f32 %v455_v35, 0.0  ;;  %v1521_v37 = vpop.f32.mrb[4].mxu0 }
  0xf7   : > { %v470_v39 = vadd.f32 %v1521_v37, %v1362_v25  ;;  %v464_v40 = vpop.f32.mrb[5].mxu0 }
  0xf8   : > { %v465_v41 = vadd.f32 %v1362_v25, %v464_v40  ;;  %1542 = vmatprep.mubr.msk.f32.mxu0 %vm547_vm3, %v525_v36 }
  0xf9   : > { %1543 = vmatmul.mubr.msk.f32.gmra.mrb[18].mxu0 %vm547_vm3, %v526_v38  ;;  %v528_v44 = vmax.f32 %v470_v39, 0.0 }
  0xfa   : > { %v527_v42 = vmax.f32 %v465_v41, 0.0  ;;  %v1524_v43 = vpop.f32.mrb[6].mxu0 }
  0xfb   : > { %v480_v45 = vadd.f32 %v1524_v43, %v1362_v25  ;;  %v474_v46 = vpop.f32.mrb[7].mxu0 }
  0xfc   : > { %v475_v47 = vadd.f32 %v1362_v25, %v474_v46  ;;  %1545 = vmatprep.mubr.msk.f32.mxu0 %vm547_vm3, %v527_v42 }
  0xfd   : > { %1546 = vmatmul.mubr.msk.f32.gmra.mrb[20].mxu0 %vm547_vm3, %v528_v44  ;;  %v530_v50 = vmax.f32 %v480_v45, 0.0 }
  0xfe   : > { %v529_v48 = vmax.f32 %v475_v47, 0.0  ;;  %v1527_v49 = vpop.f32.mrb[8].mxu0 }
  0xff   : > { %v490_v51 = vadd.f32 %v1527_v49, %v1362_v25  ;;  %v484_v52 = vpop.f32.mrb[9].mxu0 }
 0x100   : > { %v485_v53 = vadd.f32 %v1362_v25, %v484_v52  ;;  %1548 = vmatprep.mubr.msk.f32.mxu1 %vm547_vm3, %v529_v48 }
 0x101   : > { %1549 = vmatmul.mubr.msk.f32.vlgmr.msra.gmra.mrb[0].mxu1 %vm547_vm3, %v530_v50  ;;  %v532_v56 = vmax.f32 %v490_v51, 0.0 }
 0x102   : > { %v531_v54 = vmax.f32 %v485_v53, 0.0  ;;  %v1530_v55 = vpop.f32.mrb[10].mxu0  ;;  %1564 = vmatpush3.msk.msra.mxu1 %vm818_vm2, %v761_v24 }
 0x103   : > { %v500_v57 = vadd.f32 %v1530_v55, %v1362_v25  ;;  %v494_v58 = vpop.f32.mrb[11].mxu0 }
 0x104   : > { %v495_v59 = vadd.f32 %v1362_v25, %v494_v58  ;;  %1551 = vmatprep.mubr.msk.f32.mxu1 %vm547_vm3, %v531_v54 }
 0x105   : > { %1552 = vmatmul.mubr.msk.f32.gmra.mrb[2].mxu1 %vm547_vm3, %v532_v56  ;;  %v534_v62 = vmax.f32 %v500_v57, 0.0 }
 0x106   : > { %v533_v60 = vmax.f32 %v495_v59, 0.0  ;;  %v1533_v61 = vpop.f32.mrb[12].mxu0  ;;  %v2015_v59 = vld [vmem:[#allocation2] ss:$0 sm:$0xff] }
 0x107   : > { %v510_v63 = vadd.f32 %v1533_v61, %v1362_v25  ;;  %v504_v0 = vpop.f32.mrb[13].mxu0 }
 0x108   : > { %v505_v1 = vadd.f32 %v1362_v25, %v504_v0  ;;  %1554 = vmatprep.mubr.msk.f32.mxu1 %vm547_vm3, %v533_v60 }
 0x109   : > { %1555 = vmatmul.mubr.msk.f32.gmra.mrb[4].mxu1 %vm547_vm3, %v534_v62  ;;  %v536_v4 = vmax.f32 %v510_v63, 0.0 }
 0x10a   : > { %v535_v2 = vmax.f32 %v505_v1, 0.0  ;;  %v1536_v3 = vpop.f32.mrb[14].mxu0 }
 0x10b   : > { %v520_v5 = vadd.f32 %v1536_v3, %v1362_v25  ;;  %v514_v6 = vpop.f32.mrb[15].mxu0 }
 0x10c   : > { %v515_v7 = vadd.f32 %v1362_v25, %v514_v6  ;;  %1557 = vmatprep.mubr.msk.f32.mxu1 %vm547_vm3, %v535_v2 }
 0x10d   : > { %1558 = vmatmul.mubr.msk.f32.gmra.mrb[6].mxu1 %vm547_vm3, %v536_v4  ;;  %v538_v9 = vmax.f32 %v520_v5, 0.0 }
 0x10e   : > { %v537_v8 = vmax.f32 %v515_v7, 0.0 }
 0x110   : > { %1560 = vmatprep.mubr.msk.f32.mxu1 %vm547_vm3, %v537_v8 }
 0x111   : > { %1561 = vmatmul.mubr.msk.f32.gmra.mrb[8].mxu1 %vm547_vm3, %v538_v9 }
 0x1c8   : > { %v1541_v11 = vpop.f32.mrb[16].mxu0 }
 0x1c9   : > { %v672_v12 = vadd.f32 %v1541_v11, %v1379_v10  ;;  %v666_v13 = vpop.f32.mrb[17].mxu0 }
 0x1ca   : > { %v667_v14 = vadd.f32 %v1379_v10, %v666_v13 }
 0x1cb   : > { %v746_v17 = vmax.f32 %v672_v12, 0.0 }
 0x1cc   : > { %v745_v15 = vmax.f32 %v667_v14, 0.0  ;;  %v1544_v16 = vpop.f32.mrb[18].mxu0 }
 0x1cd   : > { %v682_v18 = vadd.f32 %v1544_v16, %v1379_v10  ;;  %v676_v19 = vpop.f32.mrb[19].mxu0 }
 0x1ce   : > { %v677_v20 = vadd.f32 %v1379_v10, %v676_v19  ;;  %1565 = vmatprep.mubr.msk.f32.mxu1 %vm769_vm4, %v745_v15 }
 0x1cf   : > { %1566 = vmatmul.mubr.msk.f32.vlgmr.msra.gmra.mrb[10].mxu1 %vm769_vm4, %v746_v17  ;;  %v748_v23 = vmax.f32 %v682_v18, 0.0 }
 0x1d0   : > { %v747_v21 = vmax.f32 %v677_v20, 0.0  ;;  %v1547_v22 = vpop.f32.mrb[20].mxu0 }
 0x1d1   : > { %v692_v24 = vadd.f32 %v1547_v22, %v1379_v10  ;;  %v686_v25 = vpop.f32.mrb[21].mxu0 }
 0x1d2   : > { %v687_v26 = vadd.f32 %v1379_v10, %v686_v25  ;;  %1568 = vmatprep.mubr.msk.f32.mxu1 %vm769_vm4, %v747_v21 }
 0x1d3   : > { %1569 = vmatmul.mubr.msk.f32.gmra.mrb[12].mxu1 %vm769_vm4, %v748_v23  ;;  %v750_v29 = vmax.f32 %v692_v24, 0.0 }
 0x1d4   : > { %v749_v27 = vmax.f32 %v687_v26, 0.0  ;;  %v1550_v28 = vpop.f32.mrb[0].mxu1 }
 0x1d5   : > { %v702_v30 = vadd.f32 %v1550_v28, %v1379_v10  ;;  %v696_v31 = vpop.f32.mrb[1].mxu1 }
 0x1d6   : > { %v697_v32 = vadd.f32 %v1379_v10, %v696_v31  ;;  %1571 = vmatprep.mubr.msk.f32.mxu1 %vm769_vm4, %v749_v27 }
 0x1d7   : > { %1572 = vmatmul.mubr.msk.f32.gmra.mrb[14].mxu1 %vm769_vm4, %v750_v29  ;;  %v752_v35 = vmax.f32 %v702_v30, 0.0 }
 0x1d8   : > { %v751_v33 = vmax.f32 %v697_v32, 0.0  ;;  %v1553_v34 = vpop.f32.mrb[2].mxu1 }
 0x1d9   : > { %v712_v36 = vadd.f32 %v1553_v34, %v1379_v10  ;;  %v706_v37 = vpop.f32.mrb[3].mxu1 }
 0x1da   : > { %v707_v38 = vadd.f32 %v1379_v10, %v706_v37  ;;  %1574 = vmatprep.mubr.msk.f32.mxu1 %vm769_vm4, %v751_v33 }
 0x1db   : > { %1575 = vmatmul.mubr.msk.f32.gmra.mrb[16].mxu1 %vm769_vm4, %v752_v35  ;;  %v754_v41 = vmax.f32 %v712_v36, 0.0 }
 0x1dc   : > { %v753_v39 = vmax.f32 %v707_v38, 0.0  ;;  %v1556_v40 = vpop.f32.mrb[4].mxu1 }
 0x1dd   : > { %v722_v42 = vadd.f32 %v1556_v40, %v1379_v10  ;;  %v716_v43 = vpop.f32.mrb[5].mxu1 }
 0x1de   : > { %v717_v44 = vadd.f32 %v1379_v10, %v716_v43  ;;  %1577 = vmatprep.mubr.msk.f32.mxu1 %vm769_vm4, %v753_v39 }
 0x1df   : > { %1578 = vmatmul.mubr.msk.f32.gmra.mrb[18].mxu1 %vm769_vm4, %v754_v41  ;;  %v756_v47 = vmax.f32 %v722_v42, 0.0 }
 0x1e0   : > { %v755_v45 = vmax.f32 %v717_v44, 0.0  ;;  %v1559_v46 = vpop.f32.mrb[6].mxu1 }
 0x1e1   : > { %v732_v48 = vadd.f32 %v1559_v46, %v1379_v10  ;;  %v726_v49 = vpop.f32.mrb[7].mxu1 }
 0x1e2   : > { %v727_v50 = vadd.f32 %v1379_v10, %v726_v49  ;;  %1580 = vmatprep.mubr.msk.f32.mxu1 %vm769_vm4, %v755_v45 }
 0x1e3   : > { %1581 = vmatmul.mubr.msk.f32.gmra.mrb[20].mxu1 %vm769_vm4, %v756_v47  ;;  %v758_v53 = vmax.f32 %v732_v48, 0.0 }
 0x1e4   : > { %v757_v51 = vmax.f32 %v727_v50, 0.0  ;;  %v1562_v52 = vpop.f32.mrb[8].mxu1 }
 0x1e5   : > { %v742_v54 = vadd.f32 %v1562_v52, %v1379_v10  ;;  %v736_v55 = vpop.f32.mrb[9].mxu1 }
 0x1e6   : > { %v737_v56 = vadd.f32 %v1379_v10, %v736_v55  ;;  %1583 = vmatprep.mubr.msk.f32.mxu1 %vm769_vm4, %v757_v51 }
 0x1e7   : > { %1584 = vmatmul.mubr.msk.f32.gmra.mrb[22].mxu1 %vm769_vm4, %v758_v53  ;;  %v760_v58 = vmax.f32 %v742_v54, 0.0 }
 0x1e8   : > { %v759_v57 = vmax.f32 %v737_v56, 0.0 }
 0x1ea   : > { %1586 = vmatprep.mubr.msk.f32.mxu1 %vm769_vm4, %v759_v57 }
 0x1eb   : > { %1587 = vmatmul.mubr.msk.f32.gmra.mrb[24].mxu1 %vm769_vm4, %v760_v58 }
 0x2a2   : > { %v1567_v60 = vpop.f32.mrb[10].mxu1 }
 0x2a3   : > { %v894_v61 = vadd.f32 %v1567_v60, %v2015_v59  ;;  %v888_v62 = vpop.f32.mrb[11].mxu1 }
 0x2a4   : > { %v889_v63 = vadd.f32 %v2015_v59, %v888_v62 }
 0x2a5   : > { %v1416_v0 = vmul.f32 -1.442695, %v894_v61 }
 0x2a6   : > { %v1415_v1 = vmul.f32 -1.442695, %v889_v63  ;;  %v1570_v2 = vpop.f32.mrb[12].mxu1 }
 0x2a7   : > { %1687 = vpow2.f32 %v1416_v0  ;;  %v904_v3 = vadd.f32 %v1570_v2, %v2015_v59  ;;  %v898_v4 = vpop.f32.mrb[13].mxu1 }
 0x2a8   : > { %1689 = vpow2.f32 %v1415_v1  ;;  %v899_v5 = vadd.f32 %v2015_v59, %v898_v4 }
 0x2a9   : > { %v1418_v6 = vmul.f32 -1.442695, %v904_v3 }
 0x2aa   : > { %v1417_v7 = vmul.f32 -1.442695, %v899_v5  ;;  %v1573_v8 = vpop.f32.mrb[14].mxu1 }
 0x2ab   : > { %1691 = vpow2.f32 %v1418_v6  ;;  %v914_v9 = vadd.f32 %v1573_v8, %v2015_v59  ;;  %v908_v10 = vpop.f32.mrb[15].mxu1 }
 0x2ac   : > { %1693 = vpow2.f32 %v1417_v7  ;;  %v909_v11 = vadd.f32 %v2015_v59, %v908_v10 }
 0x2ad   : > { %v1420_v12 = vmul.f32 -1.442695, %v914_v9 }
 0x2ae   : > { %v1419_v13 = vmul.f32 -1.442695, %v909_v11  ;;  %v1576_v14 = vpop.f32.mrb[16].mxu1 }
 0x2af   : > { %1695 = vpow2.f32 %v1420_v12  ;;  %v924_v15 = vadd.f32 %v1576_v14, %v2015_v59  ;;  %v918_v16 = vpop.f32.mrb[17].mxu1 }
 0x2b0   : > { %1697 = vpow2.f32 %v1419_v13  ;;  %v919_v17 = vadd.f32 %v2015_v59, %v918_v16 }
 0x2b1   : > { %v1688_v18 = vpop.eup %1687  ;;  %v1422_v19 = vmul.f32 -1.442695, %v924_v15 }
 0x2b2   : > { %v1690_v20 = vpop.eup %1689  ;;  %v1016_v21 = vadd.f32 1.0, %v1688_v18  ;;  %v1421_v22 = vmul.f32 -1.442695, %v919_v17  ;;  %v1579_v23 = vpop.f32.mrb[18].mxu1 }
 0x2b3   : > { %v1015_v24 = vadd.f32 1.0, %v1690_v20  ;;  %1699 = vpow2.f32 %v1422_v19  ;;  %v934_v25 = vadd.f32 %v1579_v23, %v2015_v59  ;;  %v928_v26 = vpop.f32.mrb[19].mxu1 }
 0x2b4   : > { %1701 = vrcp.f32 %v1016_v21  ;;  %v929_v27 = vadd.f32 %v2015_v59, %v928_v26 }
 0x2b5   : > { %v1692_v28 = vpop.eup %1691  ;;  %1703 = vrcp.f32 %v1015_v24  ;;  %v1424_v29 = vmul.f32 -1.442695, %v934_v25 }
 0x2b6   : > { %v1694_v30 = vpop.eup %1693  ;;  %v1018_v31 = vadd.f32 1.0, %v1692_v28  ;;  %1705 = vpow2.f32 %v1421_v22  ;;  %v1423_v32 = vmul.f32 -1.442695, %v929_v27  ;;  %v1582_v33 = vpop.f32.mrb[20].mxu1 }
 0x2b7   : > { %v1017_v34 = vadd.f32 1.0, %v1694_v30  ;;  %1707 = vpow2.f32 %v1424_v29  ;;  %v944_v35 = vadd.f32 %v1582_v33, %v2015_v59  ;;  %v938_v36 = vpop.f32.mrb[21].mxu1 }
 0x2b8   : > { %1709 = vrcp.f32 %v1018_v31  ;;  %v939_v37 = vadd.f32 %v2015_v59, %v938_v36 }
 0x2b9   : > { %v1696_v38 = vpop.eup %1695  ;;  %1711 = vrcp.f32 %v1017_v34  ;;  %v1426_v39 = vmul.f32 -1.442695, %v944_v35 }
 0x2ba   : > { %v1698_v40 = vpop.eup %1697  ;;  %v1020_v41 = vadd.f32 1.0, %v1696_v38  ;;  %1713 = vpow2.f32 %v1423_v32  ;;  %v1425_v42 = vmul.f32 -1.442695, %v939_v37  ;;  %v1585_v43 = vpop.f32.mrb[22].mxu1 }
 0x2bb   : > { %v1019_v44 = vadd.f32 1.0, %v1698_v40  ;;  %1715 = vpow2.f32 %v1426_v39  ;;  %v954_v45 = vadd.f32 %v1585_v43, %v2015_v59  ;;  %v948_v46 = vpop.f32.mrb[23].mxu1 }
 0x2bc   : > { %1717 = vrcp.f32 %v1020_v41  ;;  %v949_v47 = vadd.f32 %v2015_v59, %v948_v46 }
 0x2bd   : > { %v1700_v48 = vpop.eup %1699  ;;  %1719 = vrcp.f32 %v1019_v44  ;;  %v1428_v49 = vmul.f32 -1.442695, %v954_v45 }
 0x2be   : > { %v1702_v50 = vpop.eup %1701  ;;  %v1022_v51 = vadd.f32 1.0, %v1700_v48  ;;  %1721 = vpow2.f32 %v1425_v42  ;;  %v1427_v52 = vmul.f32 -1.442695, %v949_v47  ;;  %v1588_v53 = vpop.f32.mrb[24].mxu1 }
 0x2bf   : > { %v1704_v54 = vpop.eup %1703  ;;  %1065 = vst.msk [vmem:[%s2032_s26 + $0x8] sm:$0xff] %vm1063_vm5, %v1702_v50  ;;  %1723 = vpow2.f32 %v1428_v49  ;;  %v964_v55 = vadd.f32 %v1588_v53, %v2015_v59  ;;  %v958_v56 = vpop.f32.mrb[25].mxu1 }
 0x2c0   : > { %v1706_v57 = vpop.eup %1705  ;;  %1064 = vst.msk [vmem:[%s2032_s26] sm:$0xff] %vm1063_vm5, %v1704_v54  ;;  %1725 = vrcp.f32 %v1022_v51  ;;  %v959_v58 = vadd.f32 %v2015_v59, %v958_v56 }
 0x2c1   : > { %v1708_v60 = vpop.eup %1707  ;;  %v1021_v61 = vadd.f32 1.0, %v1706_v57  ;;  %1727 = vpow2.f32 %v1427_v52  ;;  %v1430_v62 = vmul.f32 -1.442695, %v964_v55 }
 0x2c2   : > { %v1710_v63 = vpop.eup %1709  ;;  %v1024_v0 = vadd.f32 1.0, %v1708_v60  ;;  %v1429_v1 = vmul.f32 -1.442695, %v959_v58 }
 0x2c3   : > { %v1712_v2 = vpop.eup %1711  ;;  %1067 = vst.msk [vmem:[%s2032_s26 + $0x18] sm:$0xff] %vm1063_vm5, %v1710_v63  ;;  %1729 = vrcp.f32 %v1021_v61 }
 0x2c4   : > { %v1714_v3 = vpop.eup %1713  ;;  %1066 = vst.msk [vmem:[%s2032_s26 + $0x10] sm:$0xff] %vm1063_vm5, %v1712_v2  ;;  %1731 = vrcp.f32 %v1024_v0 }
 0x2c5   : > { %v1716_v4 = vpop.eup %1715  ;;  %v1023_v5 = vadd.f32 1.0, %v1714_v3  ;;  %1733 = vpow2.f32 %v1430_v62 }
 0x2c6   : > { %v1718_v59 = vpop.eup %1717  ;;  %v1026_v6 = vadd.f32 1.0, %v1716_v4  ;;  %1735 = vpow2.f32 %v1429_v1 }
 0x2c7   : > { %v1720_v7 = vpop.eup %1719  ;;  %1069 = vst.msk [vmem:[%s2032_s26 + $0x28] sm:$0xff] %vm1063_vm5, %v1718_v59  ;;  %1737 = vrcp.f32 %v1023_v5 }
 0x2c8   : > { %v1722_v8 = vpop.eup %1721  ;;  %1068 = vst.msk [vmem:[%s2032_s26 + $0x20] sm:$0xff] %vm1063_vm5, %v1720_v7  ;;  %1739 = vrcp.f32 %v1026_v6 }
 0x2c9   : > { %v1724_v9 = vpop.eup %1723  ;;  %v1025_v10 = vadd.f32 1.0, %v1722_v8 }
 0x2ca   : > { %v1726_v11 = vpop.eup %1725  ;;  %v1028_v12 = vadd.f32 1.0, %v1724_v9 }
 0x2cb   : > { %v1728_v13 = vpop.eup %1727  ;;  %1071 = vst.msk [vmem:[%s2032_s26 + $0x38] sm:$0xff] %vm1063_vm5, %v1726_v11  ;;  %1741 = vrcp.f32 %v1025_v10 }
 0x2cc   : > { %1743 = vrcp.f32 %v1028_v12  ;;  %v1027_v14 = vadd.f32 1.0, %v1728_v13 }
 0x2cd   : > { %v1730_v15 = vpop.eup %1729 }
 0x2ce   : > { %v1732_v16 = vpop.eup %1731  ;;  %1070 = vst.msk [vmem:[%s2032_s26 + $0x30] sm:$0xff] %vm1063_vm5, %v1730_v15  ;;  %1745 = vrcp.f32 %v1027_v14 }
 0x2cf   : > { %v1734_v17 = vpop.eup %1733  ;;  %1073 = vst.msk [vmem:[%s2032_s26 + $0x48] sm:$0xff] %vm1063_vm5, %v1732_v16 }
 0x2d0   : > { %v1736_v18 = vpop.eup %1735  ;;  %v1030_v19 = vadd.f32 1.0, %v1734_v17 }
 0x2d1   : > { %v1738_v20 = vpop.eup %1737  ;;  %v1029_v21 = vadd.f32 1.0, %v1736_v18 }
 0x2d2   : > { %v1740_v22 = vpop.eup %1739  ;;  %1072 = vst.msk [vmem:[%s2032_s26 + $0x40] sm:$0xff] %vm1063_vm5, %v1738_v20  ;;  %1747 = vrcp.f32 %v1030_v19 }
 0x2d3   : > { %1075 = vst.msk [vmem:[%s2032_s26 + $0x58] sm:$0xff] %vm1063_vm5, %v1740_v22  ;;  %1749 = vrcp.f32 %v1029_v21 }
 0x2d5   : > { %v1742_v23 = vpop.eup %1741 }
 0x2d6   : > { %v1744_v24 = vpop.eup %1743  ;;  %1074 = vst.msk [vmem:[%s2032_s26 + $0x50] sm:$0xff] %vm1063_vm5, %v1742_v23 }
 0x2d7   : > { %1077 = vst.msk [vmem:[%s2032_s26 + $0x68] sm:$0xff] %vm1063_vm5, %v1744_v24 }
 0x2d8   : > { %v1746_v25 = vpop.eup %1745  ;;  %1086 = sbr.rel (!%p1907_p4) target bundleno = 784 (0x310), region = 52 }
 0x2d9   : > { %1076 = vst.msk [vmem:[%s2032_s26 + $0x60] sm:$0xff] %vm1063_vm5, %v1746_v25 }
 0x2dc   : > { %v1748_v26 = vpop.eup %1747 }
 0x2dd   : > { %v1750_v27 = vpop.eup %1749  ;;  %1079 = vst.msk [vmem:[%s2032_s26 + $0x78] sm:$0xff] %vm1063_vm5, %v1748_v26 }
 0x2de   : > { %1078 = vst.msk [vmem:[%s2032_s26 + $0x70] sm:$0xff] %vm1063_vm5, %v1750_v27 }
 0x2df   : > { %s2184_s18 = smov (!%p1089_p8, %s1088_s18), 16 }
 0x2e0   : > { %s1433_s23 = sshll.u32 %s2184_s18, 7 }
 0x2e1   : > { %p1436_p9 = scmp.eq.s32.totalorder %s1433_s23, 0 }
 0x2e2   : > { %s2081_s24 = sshrl.u32 (!%p1436_p9), %s2184_s18, 4 }
 0x2e3   : > { %1097 = sbr.rel (%p1436_p9) target bundleno = 784 (0x310), region = 56  ;;  %p1437_p10 = scmp.le.s32.totalorder (!%p1436_p9), %s2081_s24, 0 }
 0x2ea   : > { %1311 = sbr.rel (%p1437_p10) target bundleno = 763 (0x2fb), region = 132  ;;  %s2177_s6 = smov (!%p1437_p10), %s2075_s22 }
 0x2eb   : > { %s2178_s10 = smov (!%p1437_p10), %s2032_s26  ;;  %s2090_s17 = smov (!%p1437_p10), 0  }
 0x2ec   : > { %s2092_s25 = smov (!%p1437_p10), 0  }
 0x2f1 LB: >> { %v1189_v28 = vld [vmem:[%s1813_s10] sm:$0xff]  ;;  %v1191_v29 = vld [vmem:[%s1813_s10 + $0x8] sm:$0xff]  ;;  %v1193_v30 = vld [vmem:[%s1813_s10 + $0x10] sm:$0xff]  ;;  %s1221_s28 = sadd.s32 1, %s1817_s17  ;;  %s1183_s25 = sadd.s32 1, %s1821_s25   ;;  %s1821_s25 = sphi %s2092_s25, %s1183_s25   ;;  %s1817_s17 = sphi %s2090_s17, %s2179_s17   ;;  %s1813_s10 = sphi %s2178_s10, %s1226_s10   ;;  %s1809_s6 = sphi %s2177_s6, %s1227_s6  }
 0x2f2   : >> { %1190 = vst [vmem:[%s1809_s6] sm:$0xff] %v1189_v28  ;;  %1192 = vst [vmem:[%s1809_s6 + $0x8] sm:$0xff] %v1191_v29  ;;  %v1195_v31 = vld [vmem:[%s1813_s10 + $0x18] sm:$0xff]  ;;  %v1197_v32 = vld [vmem:[%s1813_s10 + $0x20] sm:$0xff]  ;;  %p1222_p11 = scmp.ge.s32.totalorder %s1221_s28, %s2081_s24  ;;  %p1182_p12 = scmp.ge.s32.totalorder %s1183_s25, %s2081_s24 }
 0x2f3   : >> { %1194 = vst [vmem:[%s1809_s6 + $0x10] sm:$0xff] %v1193_v30  ;;  %v1199_v33 = vld [vmem:[%s1813_s10 + $0x28] sm:$0xff]  ;;  %1196 = vst [vmem:[%s1809_s6 + $0x18] sm:$0xff] %v1195_v31  ;;  %v1201_v34 = vld [vmem:[%s1813_s10 + $0x30] sm:$0xff] }
 0x2f4   : >> { %1198 = vst [vmem:[%s1809_s6 + $0x20] sm:$0xff] %v1197_v32  ;;  %1200 = vst [vmem:[%s1809_s6 + $0x28] sm:$0xff] %v1199_v33  ;;  %v1203_v35 = vld [vmem:[%s1813_s10 + $0x38] sm:$0xff]  ;;  %v1205_v36 = vld [vmem:[%s1813_s10 + $0x40] sm:$0xff]  ;;  %s2186_s28 = smov (%p1222_p11, %s1221_s28), 0  ;;  %1185 = sbr.rel (!%p1182_p12) target bundleno = 753 (0x2f1), region = 138 }
 0x2f5   : >> { %1202 = vst [vmem:[%s1809_s6 + $0x30] sm:$0xff] %v1201_v34  ;;  %1204 = vst [vmem:[%s1809_s6 + $0x38] sm:$0xff] %v1203_v35  ;;  %v1207_v37 = vld [vmem:[%s1813_s10 + $0x48] sm:$0xff]  ;;  %v1209_v38 = vld [vmem:[%s1813_s10 + $0x50] sm:$0xff]  ;;  %s1438_s30 = sshll.u32 %s2186_s28, 7  ;;  %s2179_s17 = smov %s2186_s28 }
 0x2f6   : >> { %1206 = vst [vmem:[%s1809_s6 + $0x40] sm:$0xff] %v1205_v36  ;;  %v1211_v39 = vld [vmem:[%s1813_s10 + $0x58] sm:$0xff]  ;;  %1208 = vst [vmem:[%s1809_s6 + $0x48] sm:$0xff] %v1207_v37  ;;  %v1213_v40 = vld [vmem:[%s1813_s10 + $0x60] sm:$0xff] }
 0x2f7   : >> { %1210 = vst [vmem:[%s1809_s6 + $0x50] sm:$0xff] %v1209_v38  ;;  %1212 = vst [vmem:[%s1809_s6 + $0x58] sm:$0xff] %v1211_v39  ;;  %v1215_v41 = vld [vmem:[%s1813_s10 + $0x68] sm:$0xff]  ;;  %v1217_v42 = vld [vmem:[%s1813_s10 + $0x70] sm:$0xff] }
 0x2f8   : >> { %1214 = vst [vmem:[%s1809_s6 + $0x60] sm:$0xff] %v1213_v40  ;;  %1216 = vst [vmem:[%s1809_s6 + $0x68] sm:$0xff] %v1215_v41  ;;  %v1219_v43 = vld [vmem:[%s1813_s10 + $0x78] sm:$0xff]  ;;  %s1226_s10 = scalar_lea.vmem %s2032_s26, %s1438_s30 [#allocation3]  }
 0x2f9   : >> { %1218 = vst [vmem:[%s1809_s6 + $0x70] sm:$0xff] %v1217_v42  ;;  %1220 = vst [vmem:[%s1809_s6 + $0x78] sm:$0xff] %v1219_v43  ;;  %s1227_s6 = scalar_lea.vmem %s2075_s22, %s1438_s30  }
 0x2fb PF: > { %s2150_s8 = sand.u32 15, %s2184_s18   ;;  %s1449_s11 = sshll.u32 %s2081_s24, 7 }
 0x2fc   : > { %s1232_s12 = scalar_lea.vmem %s2032_s26, %s1449_s11 [#allocation3]   ;;  %s1234_s13 = scalar_lea.vmem %s2075_s22, %s1449_s11  }
 0x2fd   : > { %p1443_p13 = scmp.le.s32.totalorder %s2150_s8, 0 }
 0x2fe   : > { %s1823_s14 = smov (!%p1443_p13), %s1234_s13   ;;  %s1827_s15 = smov (!%p1443_p13), %s1232_s12  }
 0x2ff   : > { %1325 = sbr.rel (%p1443_p13) target bundleno = 784 (0x310), region = 143  ;;  %s1831_s16 = smov (!%p1443_p13), 0  }
 0x300   : > { %s1835_s19 = smov (!%p1443_p13), 0  }
 0x306 LB: >> { %v1244_v44 = vld [vmem:[%s1829_s15] sm:$0xff]  ;;  %s1246_s18 = sadd.s32 1, %s1833_s16  ;;  %s1238_s19 = sadd.s32 1, %s1837_s19   ;;  %s1837_s19 = sphi %s1835_s19, %s1238_s19   ;;  %s1833_s16 = sphi %s1831_s16, %s1832_s16   ;;  %s1829_s15 = sphi %s1827_s15, %s1251_s15   ;;  %s1825_s14 = sphi %s1823_s14, %s1252_s14  }
 0x307   : >> { %1245 = vst [vmem:[%s1825_s14] sm:$0xff] %v1244_v44  ;;  %p1247_p0 = scmp.ge.s32.totalorder %s1246_s18, %s2150_s8  ;;  %p1237_p1 = scmp.ge.s32.totalorder %s1238_s19, %s2150_s8 }
 0x309   : >> { %s2188_s18 = smov (%p1247_p0, %s1246_s18), 0  ;;  %1240 = sbr.rel (!%p1237_p1) target bundleno = 774 (0x306), region = 149 }
 0x30a   : >> { %s1444_s26 = sshll.u32 %s2188_s18, 3  ;;  %s1832_s16 = smov %s2188_s18  }
 0x30b   : >> { %s1251_s15 = scalar_lea.vmem %s1232_s12, %s1444_s26 [#allocation3]   ;;  %s1252_s14 = scalar_lea.vmem %s1234_s13, %s1444_s26  }
 0x310 PF: > { %p16_p2 = scmp.ge.s32.totalorder %s1897_s29, 5   ;;  %s2180_s26 = smov %s1801_s27 }
 0x311   : > { %s2181_s27 = smov %s1905_s9  ;;  %s2182_s28 = smov %s1897_s29 }
 0x312   :  { %18 = sbr.rel (!%p16_p2) target bundleno = 5 (0x5), region = 160 }

</bundles_post_ra>
